<compile_context>
chip_gen: v7x
topology: tpu7x:2x2x1
jax: 0.10.0
libtpu: 0.0.40
codegen_flags: <defaults>
</compile_context>

<pallas_src>
import functools

import jax
import jax.numpy as jnp
from jax import lax
from jax.experimental import pallas as pl
from jax.experimental.pallas import tpu as pltpu


# --------------------------------------------------------------------------- #
# Small helpers
# --------------------------------------------------------------------------- #
def _round_up(x, m):
    return (x + m - 1) // m * m


def _pick_tile(dim, candidates):
    for c in candidates:
        if dim % c == 0:
            return c
    return candidates[-1]


# --------------------------------------------------------------------------- #
# Pallas GEMM kernels (bias / residual / ReLU fused epilogue)
# --------------------------------------------------------------------------- #
def _gemm_kernel(a_ref, b_ref, bias_ref, o_ref, acc_ref, *, relu):
    @pl.when(pl.program_id(2) == 0)
    def _():
        acc_ref[...] = jnp.zeros_like(acc_ref)

    acc_ref[...] += jnp.dot(a_ref[...], b_ref[...],
                            preferred_element_type=jnp.float32)

    @pl.when(pl.program_id(2) == pl.num_programs(2) - 1)
    def _():
        out = acc_ref[...] + bias_ref[...]
        if relu:
            out = jnp.maximum(out, 0.0)
        o_ref[...] = out.astype(o_ref.dtype)


def _gemm_res_kernel(a_ref, b_ref, bias_ref, res_ref, o_ref, acc_ref, *, relu):
    @pl.when(pl.program_id(2) == 0)
    def _():
        acc_ref[...] = jnp.zeros_like(acc_ref)

    acc_ref[...] += jnp.dot(a_ref[...], b_ref[...],
                            preferred_element_type=jnp.float32)

    @pl.when(pl.program_id(2) == pl.num_programs(2) - 1)
    def _():
        out = acc_ref[...] + bias_ref[...] + res_ref[...].astype(jnp.float32)
        if relu:
            out = jnp.maximum(out, 0.0)
        o_ref[...] = out.astype(o_ref.dtype)


@functools.lru_cache(maxsize=None)
def _gemm_call(Mp, Kp, Np, tm, tk, tn, relu, has_res, out_dtype):
    grid = (Mp // tm, Np // tn, Kp // tk)
    in_specs = [
        pl.BlockSpec((tm, tk), lambda i, j, k: (i, k)),   # activations (bf16)
        pl.BlockSpec((tk, tn), lambda i, j, k: (k, j)),   # weights (bf16)
        pl.BlockSpec((1, tn), lambda i, j, k: (0, j)),    # fused bias (f32)
    ]
    if has_res:
        # residual block index is independent of k -> fetched once per (i, j)
        in_specs.append(pl.BlockSpec((tm, tn), lambda i, j, k: (i, j)))
        kernel = functools.partial(_gemm_res_kernel, relu=relu)
    else:
        kernel = functools.partial(_gemm_kernel, relu=relu)
    return pl.pallas_call(
        kernel,
        out_shape=jax.ShapeDtypeStruct((Mp, Np), out_dtype),
        grid=grid,
        in_specs=in_specs,
        out_specs=pl.BlockSpec((tm, tn), lambda i, j, k: (i, j)),
        scratch_shapes=[pltpu.VMEM((tm, tn), jnp.float32)],
        compiler_params=pltpu.CompilerParams(
            dimension_semantics=("parallel", "parallel", "arbitrary")),
    )


def fused_gemm(a, wmat, bias, residual=None, *, relu=False, out_dtype=jnp.bfloat16):
    """a:(M,K) @ wmat:(Kp,Np) bf16 + bias:(1,Np) [+ residual:(M,N)] -> (M,Np) out_dtype."""
    M, K = a.shape
    Kp, Np = wmat.shape
    if M >= 256:
        Mp, tm = _round_up(M, 256), 256
    else:
        Mp = _round_up(M, 8)
        tm = Mp
    tk = _pick_tile(Kp, (512, 256, 128))
    tn = _pick_tile(Np, (256, 128))

    a = a.astype(jnp.bfloat16)
    if (Mp, Kp) != (M, K):
        a = jnp.pad(a, ((0, Mp - M), (0, Kp - K)))

    if residual is not None:
        r = residual.astype(jnp.bfloat16)          # bf16 residual -> half the DMA bytes
        if r.shape != (Mp, Np):
            r = jnp.pad(r, ((0, Mp - r.shape[0]), (0, Np - r.shape[1])))
        out = _gemm_call(Mp, Kp, Np, tm, tk, tn, relu, True, out_dtype)(a, wmat, bias, r)
    else:
        out = _gemm_call(Mp, Kp, Np, tm, tk, tn, relu, False, out_dtype)(a, wmat, bias)
    return out[:M]


# --------------------------------------------------------------------------- #
# Convolution wrapper (NHWC; 1x1 convs skip im2col entirely)
# --------------------------------------------------------------------------- #
@functools.partial(
    jax.jit,
    static_argnames=("kh", "kw", "oc", "stride", "padding", "dilation", "relu",
                     "out_dtype"))
def conv_block(x, wmat, bias, residual=None, *, kh, kw, oc,
               stride=1, padding=0, dilation=1, relu=False,
               out_dtype=jnp.bfloat16):
    B, H, W, C = x.shape
    OH = (H + 2 * padding - dilation * (kh - 1) - 1) // stride + 1
    OW = (W + 2 * padding - dilation * (kw - 1) - 1) // stride + 1

    if kh == 1 and kw == 1 and padding == 0:
        xs = x[:, ::stride, ::stride, :] if stride > 1 else x
        a = xs.reshape(B * OH * OW, C)
    else:
        xp = jnp.pad(x, ((0, 0), (padding, padding), (padding, padding), (0, 0)))
        taps = []
        for i in range(kh):
            for j in range(kw):
                di, dj = i * dilation, j * dilation
                taps.append(xp[:, di:di + stride * (OH - 1) + 1:stride,
                               dj:dj + stride * (OW - 1) + 1:stride, :])
        a = jnp.concatenate(taps, axis=-1).reshape(B * OH * OW, C * kh * kw)

    res2d = None if residual is None else residual.reshape(B * OH * OW, oc)
    out = fused_gemm(a, wmat, bias, res2d, relu=relu, out_dtype=out_dtype)
    return out[:, :oc].reshape(B, OH, OW, oc)


def apply_conv(p, x, *, stride=1, padding=0, dilation=1, relu=False,
               residual=None, out_dtype=jnp.bfloat16):
    return conv_block(x, p["w"], p["b"], residual,
                      kh=p["kh"], kw=p["kw"], oc=p["oc"],
                      stride=stride, padding=padding, dilation=dilation,
                      relu=relu, out_dtype=out_dtype)


# --------------------------------------------------------------------------- #
# Matting head Pallas kernel: operates on (C, B, H*W) so H*W is the lane dim
# --------------------------------------------------------------------------- #
def _head_kernel(x_ref, src_ref, pha_ref, fgr_ref, err_ref, hid_ref):
    x = x_ref[...]            # (C, B, HW)
    src = src_ref[...]        # (3, B, HW)
    pha_ref[...] = jnp.clip(x[0:1], 0.0, 1.0)
    fgr_ref[...] = jnp.clip(x[1:4] + src, 0.0, 1.0)
    err_ref[...] = jnp.clip(x[4:5], 0.0, 1.0)
    hid_ref[...] = jnp.maximum(x[5:], 0.0)


def matting_head(x_cbhw, src_cbhw):
    C, B, HW = x_cbhw.shape
    full = lambda i: (0, 0, 0)
    return pl.pallas_call(
        _head_kernel,
        out_shape=(jax.ShapeDtypeStruct((1, B, HW), jnp.float32),
                   jax.ShapeDtypeStruct((3, B, HW), jnp.float32),
                   jax.ShapeDtypeStruct((1, B, HW), jnp.float32),
                   jax.ShapeDtypeStruct((C - 5, B, HW), jnp.float32)),
        grid=(1,),
        in_specs=[pl.BlockSpec((C, B, HW), full),
                  pl.BlockSpec((3, B, HW), full)],
        out_specs=(pl.BlockSpec((1, B, HW), full),
                   pl.BlockSpec((3, B, HW), full),
                   pl.BlockSpec((1, B, HW), full),
                   pl.BlockSpec((C - 5, B, HW), full)),
    )(x_cbhw, src_cbhw)


# --------------------------------------------------------------------------- #
# Plain-JAX glue (pool / resize) in NHWC
# --------------------------------------------------------------------------- #
def maxpool_3x3_s2_p1(x):
    return lax.reduce_window(
        x, jnp.array(-jnp.inf, x.dtype), lax.max,
        window_dimensions=(1, 3, 3, 1), window_strides=(1, 2, 2, 1),
        padding=((0, 0), (1, 1), (1, 1), (0, 0)))


def _lin_idx(out_size, in_size):
    o = jnp.arange(out_size, dtype=jnp.float32)
    src = (o + 0.5) * (in_size / out_size) - 0.5          # align_corners=False
    src = jnp.maximum(src, 0.0)
    i0 = jnp.minimum(jnp.floor(src).astype(jnp.int32), in_size - 1)
    i1 = jnp.minimum(i0 + 1, in_size - 1)
    frac = jnp.clip(src - i0.astype(jnp.float32), 0.0, 1.0)
    return i0, i1, 1.0 - frac, frac


def bilinear_resize(x, out_h, out_w):
    B, H, W, C = x.shape
    if (H, W) == (out_h, out_w):
        return x
    i0, i1, wh0, wh1 = _lin_idx(out_h, H)
    j0, j1, ww0, ww1 = _lin_idx(out_w, W)
    rows = (x[:, i0, :, :] * wh0[None, :, None, None]
            + x[:, i1, :, :] * wh1[None, :, None, None])
    out = (rows[:, :, j0, :] * ww0[None, None, :, None]
           + rows[:, :, j1, :] * ww1[None, None, :, None])
    return out


# --------------------------------------------------------------------------- #
# Parameter init + BN folding / weight packing (GEMM-ready, bf16, 128-padded)
# --------------------------------------------------------------------------- #
class Init:
    def __init__(self, seed=0):
        self.key = jax.random.PRNGKey(seed)

    def conv(self, oc, ic, kh, kw):
        self.key, sub = jax.random.split(self.key)
        std = (1.0 / (ic * kh * kw)) ** 0.5
        return jax.random.normal(sub, (oc, ic, kh, kw), jnp.float32) * std

    def bn(self, c):
        return {"gamma": jnp.ones((c,), jnp.float32), "beta": jnp.zeros((c,), jnp.float32),
                "mean": jnp.zeros((c,), jnp.float32), "var": jnp.ones((c,), jnp.float32)}

    def bias(self, c):
        return jnp.zeros((c,), jnp.float32)


def prep_conv(w, bn=None, bias=None, eps=1e-5):
    """Fold eval-mode BN / bias into the conv, pack as a padded bf16 (Kp, Np) GEMM weight."""
    oc, ic, kh, kw = w.shape
    if bn is not None:
        s = bn["gamma"] / jnp.sqrt(bn["var"] + eps)
        w = w * s[:, None, None, None]
        b = bn["beta"] - bn["mean"] * s
    elif bias is not None:
        b = bias
    else:
        b = jnp.zeros((oc,), jnp.float32)
    wmat = w.transpose(2, 3, 1, 0).reshape(kh * kw * ic, oc)   # rows match tap/channel order
    K, N = wmat.shape
    Kp, Np = _round_up(K, 128), _round_up(N, 128)
    wmat = jnp.pad(wmat, ((0, Kp - K), (0, Np - N))).astype(jnp.bfloat16)
    bvec = jnp.pad(b, (0, Np - N)).reshape(1, Np).astype(jnp.float32)
    return {"w": wmat, "b": bvec, "kh": int(kh), "kw": int(kw), "oc": int(oc)}


def make_bottleneck(init, inplanes, planes, stride, conv2_dilation, downsample, down_stride):
    p = {"conv1": prep_conv(init.conv(planes, inplanes, 1, 1), init.bn(planes)),
         "conv2": prep_conv(init.conv(planes, planes, 3, 3), init.bn(planes)),
         "conv3": prep_conv(init.conv(planes * 4, planes, 1, 1), init.bn(planes * 4)),
         "stride": stride, "dilation": conv2_dilation}
    if downsample:
        p["down"] = prep_conv(init.conv(planes * 4, inplanes, 1, 1), init.bn(planes * 4))
        p["down_stride"] = down_stride
    return p


def make_layer(init, inplanes, planes, blocks, stride, dilate, cur_dilation):
    previous_dilation = cur_dilation
    if dilate:
        cur_dilation *= stride
        stride = 1
    downsample = (stride != 1) or (inplanes != planes * 4)
    layer = [make_bottleneck(init, inplanes, planes, stride, previous_dilation,
                             downsample, stride)]
    inplanes = planes * 4
    for _ in range(1, blocks):
        layer.append(make_bottleneck(init, inplanes, planes, 1, cur_dilation, False, 1))
    return layer, inplanes, cur_dilation


def init_matting_base_params(seed=0):
    init = Init(seed)
    P = {}
    # ResNet50 encoder, in_channels = 6 (cat of src & bgr), dilated last stage.
    P["conv1"] = prep_conv(init.conv(64, 6, 7, 7), init.bn(64))
    layers = []
    inplanes, dilation = 64, 1
    for planes, blocks, stride, dilate in [(64, 3, 1, False), (128, 4, 2, False),
                                           (256, 6, 2, False), (512, 3, 2, True)]:
        layer, inplanes, dilation = make_layer(init, inplanes, planes, blocks,
                                               stride, dilate, dilation)
        layers.append(layer)
    P["layers"] = layers
    # ASPP(2048, [3, 6, 9]) -> 256
    aspp = {"b0": prep_conv(init.conv(256, 2048, 1, 1), init.bn(256))}
    for r_i in range(3):
        aspp[f"b{r_i + 1}"] = prep_conv(init.conv(256, 2048, 3, 3), init.bn(256))
    aspp["pool"] = prep_conv(init.conv(256, 2048, 1, 1), init.bn(256))
    aspp["proj"] = prep_conv(init.conv(256, 5 * 256, 1, 1), init.bn(256))
    P["aspp"] = aspp
    # Decoder([256, 128, 64, 48, 37], [512, 256, 64, 6])
    ch, fc = [256, 128, 64, 48, 37], [512, 256, 64, 6]
    dec = {"conv1": prep_conv(init.conv(ch[1], fc[0] + ch[0], 3, 3), init.bn(ch[1])),
           "conv2": prep_conv(init.conv(ch[2], fc[1] + ch[1], 3, 3), init.bn(ch[2])),
           "conv3": prep_conv(init.conv(ch[3], fc[2] + ch[2], 3, 3), init.bn(ch[3])),
           "conv4": prep_conv(init.conv(ch[4], fc[3] + ch[3], 3, 3), bias=init.bias(ch[4]))}
    P["decoder"] = dec
    return P


# --------------------------------------------------------------------------- #
# Forward pass (all activations NHWC, bf16 between Pallas GEMMs)
# --------------------------------------------------------------------------- #
def bottleneck_forward(bp, x):
    out = apply_conv(bp["conv1"], x, relu=True)
    out = apply_conv(bp["conv2"], out, stride=bp["stride"], padding=bp["dilation"],
                     dilation=bp["dilation"], relu=True)
    if "down" in bp:
        identity = apply_conv(bp["down"], x, stride=bp["down_stride"])
    else:
        identity = x
    # conv3 + BN (folded) + residual add + ReLU, all fused in the GEMM epilogue.
    return apply_conv(bp["conv3"], out, relu=True, residual=identity)


def run_layer(layer, x):
    for bp in layer:
        x = bottleneck_forward(bp, x)
    return x


def resnet_encoder(P, x):
    x0 = x                                           # 1/1  (6 ch)
    x = apply_conv(P["conv1"], x, stride=2, padding=3, relu=True)
    x1 = x                                           # 1/2  (64 ch)
    x = maxpool_3x3_s2_p1(x)
    x = run_layer(P["layers"][0], x)
    x2 = x                                           # 1/4  (256 ch)
    x = run_layer(P["layers"][1], x)
    x3 = x                                           # 1/8  (512 ch)
    x = run_layer(P["layers"][2], x)
    x = run_layer(P["layers"][3], x)
    x4 = x                                           # 1/16 (2048 ch, dilated)
    return x4, x3, x2, x1, x0


def aspp_forward(A, x):
    B, H, W, C = x.shape
    res = [apply_conv(A["b0"], x, relu=True)]
    for i, rate in enumerate((3, 6, 9)):
        res.append(apply_conv(A[f"b{i + 1}"], x, padding=rate, dilation=rate, relu=True))
    pooled = jnp.mean(x.astype(jnp.float32), axis=(1, 2), keepdims=True)
    pooled = apply_conv(A["pool"], pooled, relu=True)
    res.append(jnp.broadcast_to(pooled, (B, H, W, pooled.shape[-1])))  # 1x1 -> HxW upsample
    x = jnp.concatenate(res, axis=-1)
    return apply_conv(A["proj"], x, relu=True)        # Dropout(0.5) identity at inference


def decoder_forward(D, x, x3, x2, x1, x0):
    bf = jnp.bfloat16
    x = bilinear_resize(x, x3.shape[1], x3.shape[2]).astype(bf)
    x = jnp.concatenate([x, x3.astype(bf)], axis=-1)
    x = apply_conv(D["conv1"], x, padding=1, relu=True)
    x = bilinear_resize(x, x2.shape[1], x2.shape[2]).astype(bf)
    x = jnp.concatenate([x, x2.astype(bf)], axis=-1)
    x = apply_conv(D["conv2"], x, padding=1, relu=True)
    x = bilinear_resize(x, x1.shape[1], x1.shape[2]).astype(bf)
    x = jnp.concatenate([x, x1.astype(bf)], axis=-1)
    x = apply_conv(D["conv3"], x, padding=1, relu=True)
    x = bilinear_resize(x, x0.shape[1], x0.shape[2]).astype(bf)
    x = jnp.concatenate([x, x0.astype(bf)], axis=-1)
    # Final conv emits f32 for the matting head.
    x = apply_conv(D["conv4"], x, padding=1, relu=False, out_dtype=jnp.float32)
    return x


def matting_base_forward(P, src, bgr):
    # src, bgr are NCHW (B, 3, H, W) as in the PyTorch API.
    x = jnp.concatenate([src, bgr], axis=1)           # (B, 6, H, W)
    x = x.transpose(0, 2, 3, 1)                       # -> NHWC
    x, *shortcuts = resnet_encoder(P, x)
    x = aspp_forward(P["aspp"], x)
    x = decoder_forward(P["decoder"], x, *shortcuts)  # (B, H, W, 37) f32
    B, H, W, C = x.shape
    x_cbhw = x.transpose(3, 0, 1, 2).reshape(C, B, H * W)
    src_cbhw = src.transpose(1, 0, 2, 3).reshape(3, B, H * W)
    pha, fgr, err, hid = matting_head(x_cbhw, src_cbhw)       # Pallas head kernel
    to_nchw = lambda t: t.reshape(t.shape[0], B, H, W).transpose(1, 0, 2, 3)
    return to_nchw(pha), to_nchw(fgr), to_nchw(err), to_nchw(hid)


# --------------------------------------------------------------------------- #
if __name__ == "__main__":
    B, H, W = 2, 16, 16
    key = jax.random.PRNGKey(0)
    k_src, k_bgr = jax.random.split(key)
    src = jax.random.uniform(k_src, (B, 3, H, W), jnp.float32)
    bgr = jax.random.uniform(k_bgr, (B, 3, H, W), jnp.float32)

    params = init_matting_base_params(seed=0)

    pha, fgr, err, hid = matting_base_forward(params, src, bgr)
    jax.block_until_ready((pha, fgr, err, hid))

    assert pha.shape == (B, 1, H, W)
    assert fgr.shape == (B, 3, H, W)
    assert err.shape == (B, 1, H, W)
    assert hid.shape == (B, 32, H, W)
    print("KERNEL_OK")
</pallas_src>

<mosaic_0001>
module attributes {stable_mosaic.version = 11 : i64} {
  func.func @_gemm_kernel(%arg0: i32, %arg1: i32, %arg2: i32, %arg3: memref<128x128xbf16, #tpu.memory_space<vmem>>, %arg4: memref<128x128xbf16, #tpu.memory_space<vmem>>, %arg5: memref<1x128xf32, #tpu.memory_space<vmem>>, %arg6: memref<128x128xbf16, #tpu.memory_space<vmem>>, %arg7: memref<128x128xf32, #tpu.memory_space<vmem>>) attributes {dimension_semantics = [#tpu.dimension_semantics<parallel>, #tpu.dimension_semantics<parallel>, #tpu.dimension_semantics<arbitrary>], iteration_bounds = array<i64: 1, 1, 3>, scalar_prefetch = 0 : i64, scratch_operands = 1 : i64, tpu.core_type = #tpu.core_type<tc>, window_params = [{transform_indices = @transform_0, window_bounds = array<i64: 128, 128>}, {transform_indices = @transform_1, window_bounds = array<i64: 128, 128>}, {transform_indices = @transform_2, window_bounds = array<i64: 1, 128>}, {transform_indices = @transform_3, window_bounds = array<i64: 128, 128>}]} {
    %c0_i32 = arith.constant 0 : i32
    %0 = arith.cmpi eq, %arg2, %c0_i32 : i32
    %1 = arith.extui %0 : i1 to i32
    %c0_i32_0 = arith.constant 0 : i32
    %2 = arith.cmpi ne, %1, %c0_i32_0 : i32
    scf.if %2 {
      %cst_9 = arith.constant 0.000000e+00 : f32
      %12 = vector.broadcast %cst_9 : f32 to vector<128x128xf32>
      %c0_10 = arith.constant 0 : index
      %c0_11 = arith.constant 0 : index
      %13 = vector.load %arg7[%c0_10, %c0_11] : memref<128x128xf32, #tpu.memory_space<vmem>>, vector<128x128xf32>
      tpu.vector_store %arg7[%c0_10, %c0_11], %12 {strides = array<i32>} : memref<128x128xf32, #tpu.memory_space<vmem>>, vector<128x128xf32>,
    } else {
    }
    %c0 = arith.constant 0 : index
    %c0_1 = arith.constant 0 : index
    %3 = vector.load %arg7[%c0, %c0_1] : memref<128x128xf32, #tpu.memory_space<vmem>>, vector<128x128xf32>
    %c0_2 = arith.constant 0 : index
    %c0_3 = arith.constant 0 : index
    %4 = vector.load %arg3[%c0_2, %c0_3] : memref<128x128xbf16, #tpu.memory_space<vmem>>, vector<128x128xbf16>
    %c0_4 = arith.constant 0 : index
    %c0_5 = arith.constant 0 : index
    %5 = vector.load %arg4[%c0_4, %c0_5] : memref<128x128xbf16, #tpu.memory_space<vmem>>, vector<128x128xbf16>
    %cst = arith.constant dense<0.000000e+00> : vector<128x128xf32>
    %6 = tpu.matmul %4, %5, %cst {dimension_numbers = #tpu.dot_dimension_numbers<[1], [0], [0], [1], [0, 0, 1, 1], [], []>} : vector<128x128xbf16>, vector<128x128xbf16>, vector<128x128xf32> -> vector<128x128xf32>
    %7 = arith.addf %3, %6 : vector<128x128xf32>
    %c0_6 = arith.constant 0 : index
    %c0_7 = arith.constant 0 : index
    %8 = vector.load %arg7[%c0_6, %c0_7] : memref<128x128xf32, #tpu.memory_space<vmem>>, vector<128x128xf32>
    tpu.vector_store %arg7[%c0_6, %c0_7], %7 {strides = array<i32>} : memref<128x128xf32, #tpu.memory_space<vmem>>, vector<128x128xf32>,
    %c2_i32 = arith.constant 2 : i32
    %9 = arith.cmpi eq, %arg2, %c2_i32 : i32
    %10 = arith.extui %9 : i1 to i32
    %c0_i32_8 = arith.constant 0 : i32
    %11 = arith.cmpi ne, %10, %c0_i32_8 : i32
    scf.if %11 {
      %c0_9 = arith.constant 0 : index
      %c0_10 = arith.constant 0 : index
      %12 = vector.load %arg7[%c0_9, %c0_10] : memref<128x128xf32, #tpu.memory_space<vmem>>, vector<128x128xf32>
      %c0_11 = arith.constant 0 : index
      %c0_12 = arith.constant 0 : index
      %13 = vector.load %arg5[%c0_11, %c0_12] : memref<1x128xf32, #tpu.memory_space<vmem>>, vector<1x128xf32>
      %14 = vector.broadcast %13 : vector<1x128xf32> to vector<128x128xf32>
      %15 = arith.addf %12, %14 : vector<128x128xf32>
      %cst_13 = arith.constant 0.000000e+00 : f32
      %16 = vector.broadcast %cst_13 : f32 to vector<128x128xf32>
      %17 = arith.maximumf %15, %16 : vector<128x128xf32>
      %18 = arith.truncf %17 : vector<128x128xf32> to vector<128x128xbf16>
      %c0_14 = arith.constant 0 : index
      %c0_15 = arith.constant 0 : index
      %19 = vector.load %arg6[%c0_14, %c0_15] : memref<128x128xbf16, #tpu.memory_space<vmem>>, vector<128x128xbf16>
      tpu.vector_store %arg6[%c0_14, %c0_15], %18 {strides = array<i32>} : memref<128x128xbf16, #tpu.memory_space<vmem>>, vector<128x128xbf16>,
    } else {
    }
    return
  }
  func.func @transform_0(%arg0: i32, %arg1: i32, %arg2: i32) -> (i32, i32) {
    %c0_i32 = arith.constant 0 : i32
    return %arg0, %arg2 : i32, i32
  }
  func.func @transform_1(%arg0: i32, %arg1: i32, %arg2: i32) -> (i32, i32) {
    %c0_i32 = arith.constant 0 : i32
    return %arg2, %arg1 : i32, i32
  }
  func.func @transform_2(%arg0: i32, %arg1: i32, %arg2: i32) -> (i32, i32) {
    %c0_i32 = arith.constant 0 : i32
    %c0_i32_0 = arith.constant 0 : i32
    return %c0_i32, %arg1 : i32, i32
  }
  func.func @transform_3(%arg0: i32, %arg1: i32, %arg2: i32) -> (i32, i32) {
    %c0_i32 = arith.constant 0 : i32
    return %arg0, %arg1 : i32, i32
  }
}

</mosaic_0001>

<bundles_post_ra>
// kernel: conv_block.1
= control target key start
LH: loop header
LB: loop body
LE: loop exit
PB: predicated region body
PF: predicated region fallthrough
CT: control target
= control target key end

     0   :  { %8 = vsyncpa [#allocation5], 0  ;;  %s1210_s12 = smov 0   ;;  %s1212_s13 = smov 0   ;;  %s1347_s0 = inlined_call_operand.vmem [shape: bf16[128,384], index: 0, kind: input, shape index: {}]   ;;  %s1348_s1 = inlined_call_operand.vmem [shape: bf16[384,128], index: 1, kind: input, shape index: {}]   ;;  %s1349_s2 = inlined_call_operand.vmem [shape: f32[1,128], index: 2, kind: input, shape index: {}]   ;;  %s1350_s3 = inlined_call_operand.hbm [shape: bf16[128,128], index: 3, kind: output, shape index: {}]  }
   0x1   :  { %s1214_s14 = smov 0   ;;  %s1216_s15 = smov 0  }
   0x2   :  { %s1218_s16 = smov 0  }
   0x3 LB: > { %s874_s17 = sadd.s32 4294967295, %s1184_s16   ;;  %s26_s18 = sadd.s32 1, %s1180_s15  ;;  %s1184_s16 = sphi %s1218_s16, %s14_s16   ;;  %s1180_s15 = sphi %s1216_s15, %s1355_s15   ;;  %s1176_s14 = sphi %s1214_s14, %s1354_s14   ;;  %s1172_s13 = sphi %s1212_s13, %s1353_s13   ;;  %s1168_s12 = sphi %s1210_s12, %s1352_s12  }
   0x4   : > { %p27_p0 = scmp.ge.s32.totalorder %s26_s18, 3  ;;  %p49_p1 = scmp.ne.s32.totalorder %s1172_s13, %s1168_s12 }
   0x5   : > { %p50_p2 = scmp.eq.s32.totalorder %s1184_s16, 0  ;;  %s42_s20 = sadd.s32 1, %s1172_s13 }
   0x6   : > { %s1357_s18 = smov (%p27_p0, %s26_s18), 0  ;;  %p877_p5 = scmp.ge.s32.totalorder %s1184_s16, 3 }
   0x7   : > { %p51_p3 = por %p50_p2, %p49_p1  ;;  %s38_s19 = ssub.s32 %s1180_s15, %s1357_s18 }
   0x8   : > { %p40_p4 = scmp.eq.s32.totalorder %s38_s19, 0  ;;  %163 = sbr.rel (%p877_p5) target bundleno = 29 (0x1d), region = 20 }
   0xa   : > { %s1246_s21 = scalar_select %p40_p4, %s1172_s13, %s42_s20  }
   0xf   : > { %166 = sbr.rel (!%p51_p3) target bundleno = 29 (0x1d), region = 24  ;;  %s168_s22 = sand.u32 (%p51_p3), 1, %s1172_s13  }
  0x10   : > { %s879_s23 = sshll.u32 (%p51_p3), %s1180_s15, 2  ;;  %s878_s24 = sshll.u32 (%p51_p3), %s168_s22, 6 }
  0x11   : > { %s1254_s27 = scalar_lea.vmem (%p51_p3), %s1347_s0, %s879_s23  ;;  %s170_s28 = scalar_lea.vmem (%p51_p3), [#allocation3], %s878_s24 }
  0x12   : > { %v191_v0 = vld [vmem:[%s1254_s27] sm:$0xf] (%p51_p3)  ;;  %v193_v1 = vld [vmem:[%s1254_s27 + $0xc] sm:$0xf] (%p51_p3)  ;;  %v195_v2 = vld [vmem:[%s1254_s27 + $0x18] sm:$0xf] (%p51_p3) }
  0x13   : > { %192 = vst [vmem:[%s170_s28] sm:$0xf] (%p51_p3), %v191_v0  ;;  %194 = vst [vmem:[%s170_s28 + $0x4] sm:$0xf] (%p51_p3), %v193_v1  ;;  %v197_v3 = vld [vmem:[%s1254_s27 + $0x24] sm:$0xf] (%p51_p3) }
  0x14   : > { %v199_v4 = vld [vmem:[%s1254_s27 + $0x30] sm:$0xf] (%p51_p3)  ;;  %196 = vst [vmem:[%s170_s28 + $0x8] sm:$0xf] (%p51_p3), %v195_v2  ;;  %198 = vst [vmem:[%s170_s28 + $0xc] sm:$0xf] (%p51_p3), %v197_v3 }
  0x15   : > { %200 = vst [vmem:[%s170_s28 + $0x10] sm:$0xf] (%p51_p3), %v199_v4  ;;  %v201_v5 = vld [vmem:[%s1254_s27 + $0x3c] sm:$0xf] (%p51_p3)  ;;  %v203_v6 = vld [vmem:[%s1254_s27 + $0x48] sm:$0xf] (%p51_p3) }
  0x16   : > { %v205_v7 = vld [vmem:[%s1254_s27 + $0x54] sm:$0xf]  ;;  %202 = vst [vmem:[%s170_s28 + $0x14] sm:$0xf] %v201_v5  ;;  %204 = vst [vmem:[%s170_s28 + $0x18] sm:$0xf] %v203_v6 }
  0x17   : > { %206 = vst [vmem:[%s170_s28 + $0x1c] sm:$0xf] %v205_v7  ;;  %v207_v8 = vld [vmem:[%s1254_s27 + $0x60] sm:$0xf]  ;;  %v209_v9 = vld [vmem:[%s1254_s27 + $0x6c] sm:$0xf] }
  0x18   : > { %v211_v10 = vld [vmem:[%s1254_s27 + $0x78] sm:$0xf]  ;;  %208 = vst [vmem:[%s170_s28 + $0x20] sm:$0xf] %v207_v8  ;;  %210 = vst [vmem:[%s170_s28 + $0x24] sm:$0xf] %v209_v9 }
  0x19   : > { %212 = vst [vmem:[%s170_s28 + $0x28] sm:$0xf] %v211_v10  ;;  %v213_v11 = vld [vmem:[%s1254_s27 + $0x84] sm:$0xf]  ;;  %v215_v12 = vld [vmem:[%s1254_s27 + $0x90] sm:$0xf] }
  0x1a   : > { %v217_v13 = vld [vmem:[%s1254_s27 + $0x9c] sm:$0xf]  ;;  %214 = vst [vmem:[%s170_s28 + $0x2c] sm:$0xf] %v213_v11  ;;  %216 = vst [vmem:[%s170_s28 + $0x30] sm:$0xf] %v215_v12 }
  0x1b   : > { %218 = vst [vmem:[%s170_s28 + $0x34] sm:$0xf] %v217_v13  ;;  %v219_v14 = vld [vmem:[%s1254_s27 + $0xa8] sm:$0xf]  ;;  %v221_v15 = vld [vmem:[%s1254_s27 + $0xb4] sm:$0xf] }
  0x1c   : > { %220 = vst [vmem:[%s170_s28 + $0x38] sm:$0xf] %v219_v14  ;;  %222 = vst [vmem:[%s170_s28 + $0x3c] sm:$0xf] %v221_v15 }
  0x1d PF: > { %p880_p6 = scmp.ge.s32.totalorder %s1184_s16, 1  ;;  %p288_p7 = scmp.lt.s32.totalorder %s1184_s16, 4 }
  0x1f   : > { %p289_p8 = pnand %p880_p6, %p288_p7 }
  0x20   : > { %s295_s29 = sand.u32 (!%p289_p8), 1, %s1168_s12   ;;  %s882_s30 = sshll.u32 (!%p289_p8), %s1176_s14, 4 }
  0x21   : > { %292 = sbr.rel (%p289_p8) target bundleno = 350 (0x15e), region = 69  ;;  %s881_s4 = sshll.u32 (!%p289_p8), %s295_s29, 6 }
  0x22   : > { %p326_p9 = scmp.lt.s32.totalorder (!%p289_p8), %s882_s30, 47  ;;  %s1281_s9 = scalar_lea.vmem (!%p289_p8), [#allocation3], %s881_s4 }
  0x23   : > { %p884_p10 = scmp.ne.s32.totalorder (!%p289_p8), %s1176_s14, 0 }
  0x28   : > { %s1359_s30 = smov (!%p326_p9, %s882_s30), 47  ;;  %342 = sbr.rel (%p884_p10) target bundleno = 50 (0x32), region = 77 }
  0x29   : > { %s883_s5 = sshll.u32 %s1359_s30, 2  ;;  %v1186_v16 = vmov (!%p884_p10), 0.0  }
  0x2a   : > { %s1279_s8 = scalar_lea.vmem %s1348_s1, %s883_s5  ;;  %343 = vst [vmem:[#allocation2] sm:$0xff] (!%p884_p10), %v1186_v16  ;;  %344 = vst [vmem:[#allocation2 + $0x8] sm:$0xff] (!%p884_p10), %v1186_v16 }
  0x2b   : > { %345 = vst [vmem:[#allocation2 + $0x10] sm:$0xff] (!%p884_p10), %v1186_v16  ;;  %346 = vst [vmem:[#allocation2 + $0x18] sm:$0xff] (!%p884_p10), %v1186_v16 }
  0x2c   : > { %347 = vst [vmem:[#allocation2 + $0x20] sm:$0xff] (!%p884_p10), %v1186_v16  ;;  %348 = vst [vmem:[#allocation2 + $0x28] sm:$0xff] (!%p884_p10), %v1186_v16 }
  0x2d   : > { %349 = vst [vmem:[#allocation2 + $0x30] sm:$0xff] (!%p884_p10), %v1186_v16  ;;  %350 = vst [vmem:[#allocation2 + $0x38] sm:$0xff] (!%p884_p10), %v1186_v16 }
  0x2e   : > { %351 = vst [vmem:[#allocation2 + $0x40] sm:$0xff] (!%p884_p10), %v1186_v16  ;;  %352 = vst [vmem:[#allocation2 + $0x48] sm:$0xff] (!%p884_p10), %v1186_v16 }
  0x2f   : > { %353 = vst [vmem:[#allocation2 + $0x50] sm:$0xff] %v1186_v16  ;;  %354 = vst [vmem:[#allocation2 + $0x58] sm:$0xff] %v1186_v16 }
  0x30   : > { %355 = vst [vmem:[#allocation2 + $0x60] sm:$0xff] %v1186_v16  ;;  %356 = vst [vmem:[#allocation2 + $0x68] sm:$0xff] %v1186_v16 }
  0x31   : > { %357 = vst [vmem:[#allocation2 + $0x70] sm:$0xff] %v1186_v16  ;;  %358 = vst [vmem:[#allocation2 + $0x78] sm:$0xff] %v1186_v16 }
  0x32 PF: > { %v1100_v17 = vld [vmem:[%s1279_s8] sm:$0xff]   ;;  %v1101_v18 = vld [vmem:[%s1279_s8 + $0x8] sm:$0xff]   ;;  %v1102_v19 = vld [vmem:[%s1279_s8 + $0x10] sm:$0xff]   ;;  %p901_p11 = scmp.ne.s32.totalorder %s1176_s14, 2 }
  0x33   : > { %1002 = vmatprep.subr.bf16.mxu0 %v1100_v17  ;;  %1034 = vmatprep.subr.bf16.mxu1 %v1100_v17  ;;  %v1103_v20 = vld [vmem:[%s1279_s8 + $0x18] sm:$0xff]   ;;  %v1108_v21 = vld [vmem:[%s1281_s9] sm:$0xff]   ;;  %v1104_v23 = vld [vmem:[%s1279_s8 + $0x20] sm:$0xff]  }
  0x34   : > { %1003 = vmatpush3.bf16.msra.mxu0 %v1100_v17  ;;  %1042 = vmatpush3.bf16.msra.mxu1 %v1100_v17  ;;  %v1109_v22 = vld [vmem:[%s1281_s9 + $0x20] sm:$0xff]   ;;  %v1105_v24 = vld [vmem:[%s1279_s8 + $0x28] sm:$0xff]   ;;  %v1107_v26 = vld [vmem:[%s1279_s8 + $0x38] sm:$0xff]  }
  0x35   : > { %1004 = vmatprep.subr.bf16.mxu0 %v1101_v18  ;;  %1035 = vmatprep.subr.bf16.mxu1 %v1101_v18  ;;  %v1106_v25 = vld [vmem:[%s1279_s8 + $0x30] sm:$0xff]   ;;  %v1110_v27 = vld [vmem:[%s1281_s9 + $0x8] sm:$0xff]   ;;  %v1112_v29 = vld [vmem:[%s1281_s9 + $0x10] sm:$0xff]  }
  0x36   : > { %1018 = vmatprep.mubr.bf16.mxu0 %v1108_v21  ;;  %1026 = vmatprep.mubr.bf16.mxu1 %v1109_v22  ;;  %v1111_v28 = vld [vmem:[%s1281_s9 + $0x28] sm:$0xff]   ;;  %v1113_v30 = vld [vmem:[%s1281_s9 + $0x30] sm:$0xff]   ;;  %v1114_v31 = vld [vmem:[%s1281_s9 + $0x18] sm:$0xff]  }
  0x37   : > { %v1115_v32 = vld [vmem:[%s1281_s9 + $0x38] sm:$0xff]   ;;  %v361_v33 = vld [vmem:[#allocation2 + $0x10] sm:$0xff]  ;;  %v359_v35 = vld [vmem:[#allocation2] sm:$0xff] }
  0x38   : > { %1005 = vmatpush3.bf16.msra.mxu0 %v1101_v18  ;;  %1043 = vmatpush3.bf16.msra.mxu1 %v1101_v18  ;;  %v369_v34 = vld [vmem:[#allocation2 + $0x50] sm:$0xff]  ;;  %v367_v36 = vld [vmem:[#allocation2 + $0x40] sm:$0xff]  ;;  %v362_v39 = vld [vmem:[#allocation2 + $0x18] sm:$0xff] }
  0x39   : > { %1006 = vmatprep.subr.bf16.mxu0 %v1102_v19  ;;  %1036 = vmatprep.subr.bf16.mxu1 %v1102_v19  ;;  %v370_v40 = vld [vmem:[#allocation2 + $0x58] sm:$0xff]  ;;  %v360_v45 = vld [vmem:[#allocation2 + $0x8] sm:$0xff]  ;;  %v365_v57 = vld [vmem:[#allocation2 + $0x30] sm:$0xff] }
  0x3a   : > { %v368_v46 = vld [vmem:[#allocation2 + $0x48] sm:$0xff]  ;;  %v373_v58 = vld [vmem:[#allocation2 + $0x70] sm:$0xff]  ;;  %v363_v59 = vld [vmem:[#allocation2 + $0x20] sm:$0xff] }
  0x3b   : > { %v371_v60 = vld [vmem:[#allocation2 + $0x60] sm:$0xff]  ;;  %v366_v63 = vld [vmem:[#allocation2 + $0x38] sm:$0xff]  ;;  %v364_v5 = vld [vmem:[#allocation2 + $0x28] sm:$0xff] }
  0x3c   : > { %1007 = vmatpush3.bf16.msra.mxu0 %v1102_v19  ;;  %1044 = vmatpush3.bf16.msra.mxu1 %v1102_v19  ;;  %v374_v0 = vld [vmem:[#allocation2 + $0x78] sm:$0xff]  ;;  %v372_v6 = vld [vmem:[#allocation2 + $0x68] sm:$0xff]  ;;  %v902_v19 = vld [vmem:[%s1349_s2] ss:$0 sm:$0xff] (!%p901_p11) }
  0x3d   : > { %1008 = vmatprep.subr.bf16.mxu0 %v1103_v20  ;;  %1037 = vmatprep.subr.bf16.mxu1 %v1103_v20 }
  0x40   : > { %1009 = vmatpush3.bf16.msra.mxu0 %v1103_v20  ;;  %1045 = vmatpush3.bf16.msra.mxu1 %v1103_v20 }
  0x41   : > { %1010 = vmatprep.subr.bf16.mxu0 %v1104_v23  ;;  %1038 = vmatprep.subr.bf16.mxu1 %v1104_v23 }
  0x44   : > { %1011 = vmatpush3.bf16.msra.mxu0 %v1104_v23  ;;  %1046 = vmatpush3.bf16.msra.mxu1 %v1104_v23 }
  0x45   : > { %1012 = vmatprep.subr.bf16.mxu0 %v1105_v24  ;;  %1039 = vmatprep.subr.bf16.mxu1 %v1105_v24 }
  0x48   : > { %1013 = vmatpush3.bf16.msra.mxu0 %v1105_v24  ;;  %1047 = vmatpush3.bf16.msra.mxu1 %v1105_v24 }
  0x49   : > { %1014 = vmatprep.subr.bf16.mxu0 %v1106_v25  ;;  %1040 = vmatprep.subr.bf16.mxu1 %v1106_v25 }
  0x4c   : > { %1015 = vmatpush3.bf16.msra.mxu0 %v1106_v25  ;;  %1048 = vmatpush3.bf16.msra.mxu1 %v1106_v25 }
  0x4d   : > { %1016 = vmatprep.subr.bf16.mxu0 %v1107_v26  ;;  %1041 = vmatprep.subr.bf16.mxu1 %v1107_v26 }
  0x50   : > { %1017 = vmatpush3.bf16.msra.mxu0 %v1107_v26  ;;  %1049 = vmatpush3.bf16.msra.mxu1 %v1107_v26 }
  0x53   : > { %1019 = vmatmul.mubr.bf16.vlgmr.msra.gmra.mrb[0].mxu0 %v1110_v27  ;;  %1027 = vmatmul.mubr.bf16.vlgmr.msra.gmra.mrb[0].mxu1 %v1111_v28 }
  0x54   : > { %1022 = vmatprep.mubr.bf16.mxu0 %v1112_v29  ;;  %1030 = vmatprep.mubr.bf16.mxu1 %v1113_v30 }
  0x5b   : > { %1023 = vmatmul.mubr.bf16.gmra.mrb[4].mxu0 %v1114_v31  ;;  %1031 = vmatmul.mubr.bf16.gmra.mrb[4].mxu1 %v1115_v32 }
 0x126   : > { %v1020_v37 = vpop.f32.mrb[0].mxu0  ;;  %v1028_v38 = vpop.f32.mrb[0].mxu1 }
 0x127   : > { %v602_v41 = vadd.f32 %v1020_v37, %v361_v33  ;;  %v610_v42 = vadd.f32 %v1028_v38, %v369_v34  ;;  %v537_v43 = vpop.f32.mrb[1].mxu0  ;;  %v569_v44 = vpop.f32.mrb[1].mxu1 }
 0x128   : > { %v600_v47 = vadd.f32 %v537_v43, %v359_v35  ;;  %v608_v48 = vadd.f32 %v569_v44, %v367_v36  ;;  %v1021_v49 = vpop.f32.mrb[2].mxu0  ;;  %v1029_v50 = vpop.f32.mrb[2].mxu1 }
 0x129   : > { %618 = vst [vmem:[#allocation2 + $0x10] sm:$0xff] %v602_v41  ;;  %626 = vst [vmem:[#allocation2 + $0x50] sm:$0xff] %v610_v42  ;;  %v603_v51 = vadd.f32 %v1021_v49, %v362_v39  ;;  %v611_v52 = vadd.f32 %v1029_v50, %v370_v40  ;;  %v540_v53 = vpop.f32.mrb[3].mxu0  ;;  %v572_v54 = vpop.f32.mrb[3].mxu1 }
 0x12a   : > { %616 = vst [vmem:[#allocation2] sm:$0xff] %v600_v47  ;;  %624 = vst [vmem:[#allocation2 + $0x40] sm:$0xff] %v608_v48  ;;  %v601_v55 = vadd.f32 %v540_v53, %v360_v45  ;;  %v609_v56 = vadd.f32 %v572_v54, %v368_v46 }
 0x12b   : > { %619 = vst [vmem:[#allocation2 + $0x18] sm:$0xff] %v603_v51  ;;  %627 = vst [vmem:[#allocation2 + $0x58] sm:$0xff] %v611_v52 }
 0x12c   : > { %617 = vst [vmem:[#allocation2 + $0x8] sm:$0xff] %v601_v55  ;;  %625 = vst [vmem:[#allocation2 + $0x48] sm:$0xff] %v609_v56 }
 0x12e   : > { %v1024_v61 = vpop.f32.mrb[4].mxu0  ;;  %v1032_v62 = vpop.f32.mrb[4].mxu1  ;;  %635 = sbr.rel (%p901_p11) target bundleno = 324 (0x144), region = 81 }
 0x12f   : > { %v606_v1 = vadd.f32 %v1024_v61, %v365_v57  ;;  %v614_v2 = vadd.f32 %v1032_v62, %v373_v58  ;;  %v553_v3 = vpop.f32.mrb[5].mxu0  ;;  %v585_v4 = vpop.f32.mrb[5].mxu1 }
 0x130   : > { %v604_v7 = vadd.f32 %v553_v3, %v363_v59  ;;  %v612_v8 = vadd.f32 %v585_v4, %v371_v60  ;;  %v1025_v9 = vpop.f32.mrb[6].mxu0  ;;  %v1033_v10 = vpop.f32.mrb[6].mxu1  ;;  %v638_v22 = vld [vmem:[#allocation2 + $0x10] sm:$0xff] (!%p901_p11) }
 0x131   : > { %622 = vst [vmem:[#allocation2 + $0x30] sm:$0xff] %v606_v1  ;;  %630 = vst [vmem:[#allocation2 + $0x70] sm:$0xff] %v614_v2  ;;  %v607_v11 = vadd.f32 %v1025_v9, %v366_v63  ;;  %v615_v12 = vadd.f32 %v1033_v10, %v374_v0  ;;  %v556_v13 = vpop.f32.mrb[7].mxu0  ;;  %v588_v14 = vpop.f32.mrb[7].mxu1  ;;  %v636_v17 = vld [vmem:[#allocation2] sm:$0xff] (!%p901_p11)  ;;  %v661_v25 = vadd.f32 (!%p901_p11), %v902_v19, %v638_v22  ;;  %v646_v37 = vld [vmem:[#allocation2 + $0x50] sm:$0xff] (!%p901_p11) }
 0x132   : > { %620 = vst [vmem:[#allocation2 + $0x20] sm:$0xff] %v604_v7  ;;  %628 = vst [vmem:[#allocation2 + $0x60] sm:$0xff] %v612_v8  ;;  %v605_v15 = vadd.f32 %v556_v13, %v364_v5  ;;  %v613_v16 = vadd.f32 %v588_v14, %v372_v6  ;;  %v659_v20 = vadd.f32 (!%p901_p11), %v902_v19, %v636_v17  ;;  %v639_v23 = vld [vmem:[#allocation2 + $0x18] sm:$0xff] (!%p901_p11)  ;;  %v644_v35 = vld [vmem:[#allocation2 + $0x40] sm:$0xff] (!%p901_p11) }
 0x133   : > { %623 = vst [vmem:[#allocation2 + $0x38] sm:$0xff] %v607_v11  ;;  %631 = vst [vmem:[#allocation2 + $0x78] sm:$0xff] %v615_v12  ;;  %v637_v18 = vld [vmem:[#allocation2 + $0x8] sm:$0xff] (!%p901_p11)  ;;  %v662_v26 = vadd.f32 (!%p901_p11), %v902_v19, %v639_v23  ;;  %v677_v38 = vmax.f32 (!%p901_p11), %v661_v25, 0.0  ;;  %v647_v42 = vld [vmem:[#allocation2 + $0x58] sm:$0xff] (!%p901_p11)  ;;  %v667_v47 = vadd.f32 (!%p901_p11), %v902_v19, %v644_v35  ;;  %v669_v52 = vadd.f32 (!%p901_p11), %v902_v19, %v646_v37 }
 0x134   : > { %621 = vst [vmem:[#allocation2 + $0x28] sm:$0xff] %v605_v15  ;;  %629 = vst [vmem:[#allocation2 + $0x68] sm:$0xff] %v613_v16  ;;  %v660_v21 = vadd.f32 (!%p901_p11), %v902_v19, %v637_v18  ;;  %v675_v31 = vmax.f32 (!%p901_p11), %v659_v20, 0.0  ;;  %v645_v36 = vld [vmem:[#allocation2 + $0x48] sm:$0xff] (!%p901_p11)  ;;  %v670_v57 = vadd.f32 (!%p901_p11), %v902_v19, %v647_v42 }
 0x135   : > { %v678_v39 = vmax.f32 %v662_v26, 0.0  ;;  %v668_v51 = vadd.f32 %v902_v19, %v645_v36  ;;  %v683_v56 = vmax.f32 %v667_v47, 0.0  ;;  %v685_v61 = vmax.f32 %v669_v52, 0.0 }
 0x136   : > { %v676_v32 = vmax.f32 %v660_v21, 0.0  ;;  %v686_v63 = vmax.f32 %v670_v57, 0.0 }
 0x137   : > { %v947_v49 = vpack.c.bf16 %v678_v39, %v677_v38  ;;  %v684_v60 = vmax.f32 %v668_v51, 0.0 }
 0x138   : > { %v642_v29 = vld [vmem:[#allocation2 + $0x30] sm:$0xff]  ;;  %v942_v44 = vpack.c.bf16 %v676_v32, %v675_v31  ;;  %v967_v5 = vpack.c.bf16 %v686_v63, %v685_v61 }
 0x139   : > { %v640_v24 = vld [vmem:[#allocation2 + $0x20] sm:$0xff]  ;;  %v665_v34 = vadd.f32 %v902_v19, %v642_v29  ;;  %v650_v53 = vld [vmem:[#allocation2 + $0x70] sm:$0xff]  ;;  %979 = vst [vmem:[#allocation4 + $0x8] sm:$0xff] %v947_v49   ;;  %v962_v3 = vpack.c.bf16 %v684_v60, %v683_v56 }
 0x13a   : > { %v663_v28 = vadd.f32 %v902_v19, %v640_v24  ;;  %v643_v30 = vld [vmem:[#allocation2 + $0x38] sm:$0xff]  ;;  %v648_v43 = vld [vmem:[#allocation2 + $0x60] sm:$0xff]  ;;  %943 = vst [vmem:[#allocation4] sm:$0xff] %v942_v44   ;;  %v673_v1 = vadd.f32 %v902_v19, %v650_v53  ;;  %983 = vst [vmem:[#allocation4 + $0x28] sm:$0xff] %v967_v5  }
 0x13b   : > { %v641_v27 = vld [vmem:[#allocation2 + $0x28] sm:$0xff]  ;;  %v666_v41 = vadd.f32 %v902_v19, %v643_v30  ;;  %v681_v46 = vmax.f32 %v665_v34, 0.0  ;;  %v651_v54 = vld [vmem:[#allocation2 + $0x78] sm:$0xff]  ;;  %v671_v58 = vadd.f32 %v902_v19, %v648_v43  ;;  %982 = vst [vmem:[#allocation4 + $0x20] sm:$0xff] %v962_v3  }
 0x13c   : > { %v664_v33 = vadd.f32 %v902_v19, %v641_v27  ;;  %v679_v40 = vmax.f32 %v663_v28, 0.0  ;;  %v649_v48 = vld [vmem:[#allocation2 + $0x68] sm:$0xff]  ;;  %v674_v2 = vadd.f32 %v902_v19, %v651_v54  ;;  %v689_v6 = vmax.f32 %v673_v1, 0.0 }
 0x13d   : > { %v682_v50 = vmax.f32 %v666_v41, 0.0  ;;  %v672_v62 = vadd.f32 %v902_v19, %v649_v48  ;;  %v687_v0 = vmax.f32 %v671_v58, 0.0 }
 0x13e   : > { %v680_v45 = vmax.f32 %v664_v33, 0.0  ;;  %v690_v7 = vmax.f32 %v674_v2, 0.0 }
 0x13f   : > { %v957_v59 = vpack.c.bf16 %v682_v50, %v681_v46  ;;  %v688_v4 = vmax.f32 %v672_v62, 0.0 }
 0x140   : > { %v952_v55 = vpack.c.bf16 %v680_v45, %v679_v40  ;;  %v977_v9 = vpack.c.bf16 %v690_v7, %v689_v6 }
 0x141   : > { %981 = vst [vmem:[#allocation4 + $0x18] sm:$0xff] %v957_v59   ;;  %v972_v8 = vpack.c.bf16 %v688_v4, %v687_v0 }
 0x142   : > { %980 = vst [vmem:[#allocation4 + $0x10] sm:$0xff] %v952_v55   ;;  %985 = vst [vmem:[#allocation4 + $0x38] sm:$0xff] %v977_v9  }
 0x143   : > { %984 = vst [vmem:[#allocation4 + $0x30] sm:$0xff] %v972_v8  }
 0x144 PF: > { %p1306_p12 = scmp.eq.s32.totalorder %s874_s17, 2  ;;  %s1187_s14 = smov [#allocation4]  }
 0x145   : > { %s781_s19 = sshll.u32 %s1187_s14, 4  ;;  %s782_s19 = int_to_ptr.vmem [resolvable:$true] %s781_s19 }
 0x146   : > { %s1116_s20 = scalar_lea.vmem %s782_s19, 1024  ;;  %p1123_p2 = scmp.lt.s32.totalorder %s782_s19, %s782_s19 }
 0x147   : > { %p1117_p13 = scmp.ne.s32.totalorder %s782_s19, %s1116_s20  ;;  %p1124_p3 = scmp.lt.s32.totalorder %s1116_s20, %s1116_s20 }
 0x149   : > { %p1118_p0 = pnand %p1117_p13, %p1306_p12  ;;  %p1125_p4 = por %p1124_p3, %p1123_p2 }
 0x14b   : > { %p1119_p1 = pneg %p1118_p0 }
 0x14d   : > { %p1126_p5 = pnand %p1125_p4, %p1119_p1 }
 0x14f   : > { %1129 = shalt.err (!%p1126_p5)
}
 0x150   : > { %s1130_s17 = scalar_lea.hbm %s1350_s3, 1024 }
 0x151   : > { %p1131_p6 = scmp.ne.s32.totalorder %s1350_s3, %s1130_s17  ;;  %p1136_p9 = scmp.lt.u32.totalorder %s1130_s17, %s1350_s3 }
 0x153   : > { %p1132_p7 = pnand %p1131_p6, %p1306_p12 }
 0x155   : > { %p1133_p8 = pneg %p1132_p7 }
 0x157   : > { %p1138_p10 = pnand %p1136_p9, %p1133_p8 }
 0x159   : > { %1141 = shalt.err (!%p1138_p10)
}
 0x15a   : > { %s1188_s28 = smov 64   ;;  %s1189_s29 = smov 4  }
 0x15b   : > { %1051 = dma.vmem_to_hbm [thread:$0]  (%p1306_p12), %s782_s19, 1024, %s1350_s3, [#allocation5], %s1188_s28, %s1188_s28, %s1189_s29  }
 0x15c   : > { %1163 = dma.done.wait (%p1306_p12), [#allocation5], 1024  }
 0x15d   : > { %1165 = vsyncadd (%p1306_p12), [#allocation5], 4294966272 }
 0x15e PF: > { %s14_s16 = sadd.s32 1, %s1184_s16   ;;  %s1352_s12 = smov %s1172_s13 }
 0x15f   : > { %p11_p11 = scmp.ge.s32.totalorder %s14_s16, 5   ;;  %s1353_s13 = smov %s1246_s21 }
 0x160   : > { %s1354_s14 = smov %s1180_s15  ;;  %s1355_s15 = smov %s1357_s18 }
 0x161   :  { %13 = sbr.rel (!%p11_p11) target bundleno = 3 (0x3), region = 120 }
 0x168   :  { %797 = vsyncpa [#allocation5], 1 }
 0x169   :  { %799 = vsyncpa [#allocation5 + $0x1], 1 }

</bundles_post_ra>
